<compile_context>
chip_gen: v7x
topology: tpu7x:2x2x1
jax: 0.10.0
libtpu: 0.0.40
codegen_flags: <defaults>
</compile_context>

<pallas_src>
import jax
import jax.numpy as jnp
from jax import lax
from jax.experimental import pallas as pl
from jax.experimental.pallas import tpu as pltpu


def _round_up(n: int, m: int) -> int:
    return ((n + m - 1) // m) * m


def _linear_kernel(x_ref, w_ref, b_ref, o_ref):
    # x_ref: (TILE_B, D)   w_ref: (C_pad, D)   b_ref: (1, C_pad)   o_ref: (TILE_B, C_pad)
    # Contract D of x against D of w (== x @ w.T) with f32 MXU accumulation.
    acc = lax.dot_general(
        x_ref[...], w_ref[...],
        dimension_numbers=(((1,), (1,)), ((), ())),
        preferred_element_type=jnp.float32,
    )
    o_ref[...] = (acc + b_ref[...]).astype(o_ref.dtype)


def logistic_regression_forward(x, weight, bias, *, tile_b: int = 512):
    """y = x @ weight.T + bias  (matches torch.nn.Linear forward).

    x:      (B, D) float32
    weight: (C, D) float32   (PyTorch nn.Linear layout, NOT pre-transposed)
    bias:   (C,)   float32
    returns (B, C) float32
    """
    B, D = x.shape
    C = weight.shape[0]

    LANE, SUBLANE = 128, 8
    c_pad = _round_up(max(C, LANE), LANE)                 # lane-dense output width
    tile_b = max(SUBLANE, min(tile_b, _round_up(B, SUBLANE)))
    b_pad = _round_up(B, tile_b)

    # Zero-pad to tile/lane boundaries.  In a real model the (C -> c_pad) weight
    # / bias padding is a one-time layout decision at init, not per-call work.
    x_p = x if b_pad == B else jnp.pad(x, ((0, b_pad - B), (0, 0)))
    w_p = weight if c_pad == C else jnp.pad(weight, ((0, c_pad - C), (0, 0)))
    b_p = (bias if c_pad == C else jnp.pad(bias, (0, c_pad - C))).reshape(1, c_pad)

    grid = (b_pad // tile_b,)

    cost = pl.CostEstimate(
        flops=2 * B * D * C,
        transcendentals=0,
        bytes_accessed=4 * (B * D + C * D + B * C + C),
    )

    out = pl.pallas_call(
        _linear_kernel,
        out_shape=jax.ShapeDtypeStruct((b_pad, c_pad), x.dtype),
        grid_spec=pltpu.PrefetchScalarGridSpec(
            num_scalar_prefetch=0,
            grid=grid,
            in_specs=[
                pl.BlockSpec((tile_b, D), lambda i: (i, 0)),   # batch tile, pipelined
                pl.BlockSpec((c_pad, D), lambda i: (0, 0)),    # weight: VMEM-resident
                pl.BlockSpec((1, c_pad), lambda i: (0, 0)),    # bias:   VMEM-resident
            ],
            out_specs=pl.BlockSpec((tile_b, c_pad), lambda i: (i, 0)),
        ),
        compiler_params=pltpu.CompilerParams(
            dimension_semantics=("parallel",),                  # megacore on v7x
            vmem_limit_bytes=32 * 1024 * 1024,
        ),
        cost_estimate=cost,
    )(x_p, w_p, b_p)

    return out[:B, :C]


if __name__ == "__main__":
    # Small shapes consistent with the module: x: (batch, input_dim).
    # batch=512 with tile_b=128 exercises a 4-step pipelined batch grid.
    batch, input_dim, num_classes = 512, 64, 10

    key = jax.random.PRNGKey(0)
    kx, kw, kb = jax.random.split(key, 3)

    x = jax.random.normal(kx, (batch, input_dim), dtype=jnp.float32)
    # Same shapes as nn.Linear(input_dim, num_classes): weight (C, D), bias (C,)
    weight = jax.random.normal(kw, (num_classes, input_dim), dtype=jnp.float32) * 0.1
    bias = jax.random.normal(kb, (num_classes,), dtype=jnp.float32) * 0.1

    out = logistic_regression_forward(x, weight, bias, tile_b=128)
    out = jax.block_until_ready(out)

    # Correctness check against plain-JAX reference of nn.Linear semantics.
    ref = x @ weight.T + bias
    assert out.shape == (batch, num_classes)
    assert jnp.allclose(out, ref, atol=1e-5, rtol=1e-5)

    print("KERNEL_OK")
</pallas_src>

<mosaic_0001>
module attributes {stable_mosaic.version = 11 : i64} {
  func.func @_linear_kernel(%arg0: i32, %arg1: memref<128x64xf32, #tpu.memory_space<vmem>>, %arg2: memref<128x64xf32, #tpu.memory_space<vmem>>, %arg3: memref<1x128xf32, #tpu.memory_space<vmem>>, %arg4: memref<128x128xf32, #tpu.memory_space<vmem>>) attributes {dimension_semantics = [#tpu.dimension_semantics<parallel>], iteration_bounds = array<i64: 4>, scalar_prefetch = 0 : i64, scratch_operands = 0 : i64, tpu.core_type = #tpu.core_type<tc>, window_params = [{transform_indices = @transform_0, window_bounds = array<i64: 128, 64>}, {pipeline_mode = #tpu.pipeline_mode<synchronous>, transform_indices = @transform_1, window_bounds = array<i64: 128, 64>}, {pipeline_mode = #tpu.pipeline_mode<synchronous>, transform_indices = @transform_2, window_bounds = array<i64: 1, 128>}, {transform_indices = @transform_3, window_bounds = array<i64: 128, 128>}]} {
    %c0 = arith.constant 0 : index
    %c0_0 = arith.constant 0 : index
    %0 = vector.load %arg1[%c0, %c0_0] : memref<128x64xf32, #tpu.memory_space<vmem>>, vector<128x64xf32>
    %c0_1 = arith.constant 0 : index
    %c0_2 = arith.constant 0 : index
    %1 = vector.load %arg2[%c0_1, %c0_2] : memref<128x64xf32, #tpu.memory_space<vmem>>, vector<128x64xf32>
    %cst = arith.constant dense<0.000000e+00> : vector<128x128xf32>
    %2 = tpu.matmul %0, %1, %cst {dimension_numbers = #tpu.dot_dimension_numbers<[1], [1], [0], [0], [0, 0, 1, 0], [], []>} : vector<128x64xf32>, vector<128x64xf32>, vector<128x128xf32> -> vector<128x128xf32>
    %c0_3 = arith.constant 0 : index
    %c0_4 = arith.constant 0 : index
    %3 = vector.load %arg3[%c0_3, %c0_4] : memref<1x128xf32, #tpu.memory_space<vmem>>, vector<1x128xf32>
    %4 = vector.broadcast %3 : vector<1x128xf32> to vector<128x128xf32>
    %5 = arith.addf %2, %4 : vector<128x128xf32>
    %c0_5 = arith.constant 0 : index
    %c0_6 = arith.constant 0 : index
    %6 = vector.load %arg4[%c0_5, %c0_6] : memref<128x128xf32, #tpu.memory_space<vmem>>, vector<128x128xf32>
    tpu.vector_store %arg4[%c0_5, %c0_6], %5 {strides = array<i32>} : memref<128x128xf32, #tpu.memory_space<vmem>>, vector<128x128xf32>,
    return
  }
  func.func @transform_0(%arg0: i32) -> (i32, i32) {
    %c0_i32 = arith.constant 0 : i32
    %c0_i32_0 = arith.constant 0 : i32
    return %arg0, %c0_i32 : i32, i32
  }
  func.func @transform_1(%arg0: i32) -> (i32, i32) {
    %c0_i32 = arith.constant 0 : i32
    %c0_i32_0 = arith.constant 0 : i32
    %c0_i32_1 = arith.constant 0 : i32
    return %c0_i32, %c0_i32_0 : i32, i32
  }
  func.func @transform_2(%arg0: i32) -> (i32, i32) {
    %c0_i32 = arith.constant 0 : i32
    %c0_i32_0 = arith.constant 0 : i32
    %c0_i32_1 = arith.constant 0 : i32
    return %c0_i32, %c0_i32_0 : i32, i32
  }
  func.func @transform_3(%arg0: i32) -> (i32, i32) {
    %c0_i32 = arith.constant 0 : i32
    %c0_i32_0 = arith.constant 0 : i32
    return %arg0, %c0_i32 : i32, i32
  }
}

</mosaic_0001>

<bundles_post_ra>
// kernel: tpu_custom_call.1
= control target key start
LH: loop header
LB: loop body
LE: loop exit
PB: predicated region body
PF: predicated region fallthrough
CT: control target
= control target key end

     0   :  { %8 = vsyncpa [#allocation3], 0  ;;  %s1151_s0 = inlined_call_operand.vmem [shape: f32[512,64], index: 0, kind: input, shape index: {}]   ;;  %s1152_s1 = inlined_call_operand.vmem [shape: f32[128,64], index: 1, kind: input, shape index: {}]   ;;  %s1153_s2 = inlined_call_operand.vmem [shape: f32[1,128], index: 2, kind: input, shape index: {}]   ;;  %s1154_s3 = inlined_call_operand.hbm [shape: f32[512,128], index: 3, kind: output, shape index: {}]  }
   0x1   :  { %10 = vsyncpa [#allocation3 + $0x1], 0  ;;  %s871_s12 = smov 0   ;;  %s873_s13 = smov 0  }
   0x2   :  { %s875_s14 = smov 0   ;;  %s877_s15 = smov 0  }
   0x3 LB: > { %s892_s16 = sadd.s32 4294967295, %s846_s15   ;;  %s545_s17 = sadd.s32 4294967294, %s846_s15   ;;  %s846_s15 = sphi %s877_s15, %s1162_s15   ;;  %s842_s14 = sphi %s875_s14, %s1161_s14   ;;  %s838_s13 = sphi %s873_s13, %s1160_s13   ;;  %s834_s12 = sphi %s871_s12, %s1159_s12  }
   0x4   : > { %s896_s18 = sadd.s32 1, %s846_s15   ;;  %s91_s19 = sadd.s32 1, %s842_s14 }
   0x5   : > { %s88_s20 = ssub.s32 %s846_s15, %s896_s18  ;;  %p101_p0 = scmp.ne.s32.totalorder %s842_s14, %s838_s13 }
   0x6   : > { %p89_p1 = scmp.eq.s32.totalorder %s88_s20, 0  ;;  %p102_p2 = scmp.eq.s32.totalorder %s892_s16, 3 }
   0x7   : > { %p107_p3 = scmp.ne.s32.totalorder %s838_s13, %s834_s12  ;;  %p108_p4 = scmp.eq.s32.totalorder %s545_s17, 3 }
   0x8   : > { %s907_s21 = scalar_select %p89_p1, %s842_s14, %s91_s19  }
   0x9   : > { %p909_p5 = por %p102_p2, %p101_p0  ;;  %p913_p6 = por %p108_p4, %p107_p3 }
   0xa   : > { %p548_p7 = scmp.ge.s32.totalorder %s846_s15, 1  ;;  %p141_p8 = scmp.lt.s32.totalorder %s846_s15, 5 }
   0xc   : > { %p142_p9 = pnand %p548_p7, %p141_p8 }
   0xd   : > { %v188_v0 = vld [vmem:[%s1152_s1] sm:$0xff] (!%p142_p9)  ;;  %v189_v1 = vld [vmem:[%s1152_s1 + $0x8] sm:$0xff] (!%p142_p9)  ;;  %vm211_vm0 = vcmask (!%p142_p9), 523264   ;;  %v190_v2 = vld [vmem:[%s1152_s1 + $0x10] sm:$0xff] (!%p142_p9)  ;;  %s550_s30 = sshll.u32 (!%p142_p9), %s892_s16, 4  ;;  %s162_s26 = sand.u32 (!%p142_p9), 1, %s838_s13  }
   0xe   : > { %145 = sbr.rel (%p142_p9) target bundleno = 323 (0x143), region = 32  ;;  %v679_v3 = vpack.c.bf16 (!%p142_p9), %v189_v1, %v188_v0  ;;  %vm931_vm1 = vmpackc.low (!%p142_p9), %vm211_vm0, %vm211_vm0  ;;  %v191_v5 = vld [vmem:[%s1152_s1 + $0x18] sm:$0xff] (!%p142_p9)  ;;  %p166_p10 = scmp.lt.s32.totalorder (!%p142_p9), %s550_s30, 63  ;;  %v192_v7 = vld [vmem:[%s1152_s1 + $0x20] sm:$0xff] (!%p142_p9) }
   0xf   : > { %v685_v6 = vpack.c.bf16 (!%p142_p9), %v191_v5, %v190_v2  ;;  %v193_v8 = vld [vmem:[%s1152_s1 + $0x28] sm:$0xff] (!%p142_p9)  ;;  %v194_v12 = vld [vmem:[%s1152_s1 + $0x30] sm:$0xff] (!%p142_p9)  ;;  %v195_v13 = vld [vmem:[%s1152_s1 + $0x38] sm:$0xff] (!%p142_p9)  ;;  %s549_s27 = sshll.u32 (!%p142_p9), %s162_s26, 7  ;;  %s1110_s7 = scalar_lea.sflag (!%p142_p9), [#allocation3], %s162_s26 }
  0x10   : > { %681 = vmatprep.subr.msk.bf16.mxu0 (!%p142_p9), %vm931_vm1, %v679_v3  ;;  %727 = vmatprep.subr.msk.bf16.mxu1 (!%p142_p9), %vm931_vm1, %v679_v3  ;;  %v691_v11 = vpack.c.bf16 (!%p142_p9), %v193_v8, %v192_v7  ;;  %v697_v14 = vpack.c.bf16 (!%p142_p9), %v195_v13, %v194_v12  ;;  %v196_v15 = vld [vmem:[%s1152_s1 + $0x40] sm:$0xff] (!%p142_p9)  ;;  %v197_v16 = vld [vmem:[%s1152_s1 + $0x48] sm:$0xff] (!%p142_p9)  ;;  %v198_v18 = vld [vmem:[%s1152_s1 + $0x50] sm:$0xff] (!%p142_p9)  ;;  %s848_s9 = smov (!%p142_p9), [#allocation2]  }
  0x11   : > { %684 = vmatpush3.bf16.xpose.msk.msra.mxu0 (!%p142_p9), %vm931_vm1, %v679_v3  ;;  %735 = vmatpush3.bf16.xpose.msk.msra.mxu1 (!%p142_p9), %vm931_vm1, %v679_v3  ;;  %v703_v17 = vpack.c.bf16 (!%p142_p9), %v197_v16, %v196_v15  ;;  %v199_v19 = vld [vmem:[%s1152_s1 + $0x58] sm:$0xff] (!%p142_p9)  ;;  %v200_v21 = vld [vmem:[%s1152_s1 + $0x60] sm:$0xff] (!%p142_p9)  ;;  %v201_v22 = vld [vmem:[%s1152_s1 + $0x68] sm:$0xff] (!%p142_p9)  ;;  %s788_s10 = sshll.u32 (!%p142_p9), %s848_s9, 4  ;;  %s789_s10 = int_to_ptr.vmem [resolvable:$false] %s788_s10 }
  0x12   : > { %687 = vmatprep.subr.msk.bf16.mxu0 (!%p142_p9), %vm931_vm1, %v685_v6  ;;  %728 = vmatprep.subr.msk.bf16.mxu1 (!%p142_p9), %vm931_vm1, %v685_v6  ;;  %v709_v20 = vpack.c.bf16 (!%p142_p9), %v199_v19, %v198_v18  ;;  %v715_v23 = vpack.c.bf16 (!%p142_p9), %v201_v22, %v200_v21  ;;  %v202_v24 = vld [vmem:[%s1152_s1 + $0x70] sm:$0xff] (!%p142_p9)  ;;  %v203_v25 = vld [vmem:[%s1152_s1 + $0x78] sm:$0xff] (!%p142_p9)  ;;  %v552_v41 = vld [vmem:[%s1153_s2] ss:$0 sm:$0xff] (!%p142_p9)  ;;  %s790_s11 = scalar_lea.vmem (!%p142_p9), %s789_s10, 4096 }
  0x13   : > { %v721_v26 = vpack.c.bf16 (!%p142_p9), %v203_v25, %v202_v24 }
  0x15   : > { %s1164_s30 = smov (!%p166_p10, %s550_s30), 63 }
  0x16   : > { %s551_s6 = sshll.u32 %s1164_s30, 3  ;;  %s590_s30 = sshll.u32 %s892_s16, 11 }
  0x17   : > { %s959_s19 = scalar_lea.vmem %s1151_s0, %s551_s6  ;;  %s1100_s16 = scalar_lea.hbm %s1154_s3, %s590_s30 }
  0x18   : > { %v172_v9 = vld [vmem:[%s959_s19] sm:$0xff]  ;;  %v173_v27 = vld [vmem:[%s959_s19 + $0x8] sm:$0xff]  ;;  %v174_v29 = vld [vmem:[%s959_s19 + $0x10] sm:$0xff] }
  0x19   : > { %v180_v10 = vld [vmem:[%s959_s19 + $0x40] sm:$0xff]  ;;  %655 = vmatprep.mubr.msk.f32.mxu0 %vm211_vm0, %v172_v9  ;;  %690 = vmatpush3.bf16.xpose.msk.msra.mxu0 %vm931_vm1, %v685_v6  ;;  %v181_v28 = vld [vmem:[%s959_s19 + $0x48] sm:$0xff]  ;;  %v182_v30 = vld [vmem:[%s959_s19 + $0x50] sm:$0xff] }
  0x1a   : > { %667 = vmatprep.mubr.msk.f32.mxu1 %vm211_vm0, %v180_v10  ;;  %736 = vmatpush3.bf16.xpose.msk.msra.mxu1 %vm931_vm1, %v685_v6  ;;  %v175_v31 = vld [vmem:[%s959_s19 + $0x18] sm:$0xff]  ;;  %v176_v33 = vld [vmem:[%s959_s19 + $0x20] sm:$0xff]  ;;  %v177_v35 = vld [vmem:[%s959_s19 + $0x28] sm:$0xff] }
  0x1b   : > { %693 = vmatprep.subr.msk.bf16.mxu0 %vm931_vm1, %v691_v11  ;;  %729 = vmatprep.subr.msk.bf16.mxu1 %vm931_vm1, %v691_v11  ;;  %v183_v32 = vld [vmem:[%s959_s19 + $0x58] sm:$0xff]  ;;  %v184_v34 = vld [vmem:[%s959_s19 + $0x60] sm:$0xff]  ;;  %v185_v36 = vld [vmem:[%s959_s19 + $0x68] sm:$0xff] }
  0x1c   : > { %v178_v37 = vld [vmem:[%s959_s19 + $0x30] sm:$0xff]  ;;  %v179_v39 = vld [vmem:[%s959_s19 + $0x38] sm:$0xff] }
  0x1d   : > { %v186_v38 = vld [vmem:[%s959_s19 + $0x70] sm:$0xff]  ;;  %v187_v40 = vld [vmem:[%s959_s19 + $0x78] sm:$0xff]  ;;  %s1081_s19 = scalar_lea.vmem [#allocation2], %s549_s27 }
  0x1e   : > { %s483_s4 = sshll.u32 %s1081_s19, 4  ;;  %s1102_s4 = int_to_ptr.vmem [resolvable:$true] %s483_s4 }
  0x1f   : > { %s784_s8 = scalar_lea.vmem %s1102_s4, 2048  ;;  %p791_p0 = scmp.lt.s32.totalorder %s1102_s4, %s789_s10 }
  0x20   : > { %p785_p11 = scmp.ne.s32.totalorder %s1102_s4, %s784_s8  ;;  %p792_p1 = scmp.lt.s32.totalorder %s790_s11, %s784_s8 }
  0x21   : > { %696 = vmatpush3.bf16.xpose.msk.msra.mxu0 %vm931_vm1, %v691_v11 }
  0x22   : > { %737 = vmatpush3.bf16.xpose.msk.msra.mxu1 %vm931_vm1, %v691_v11  ;;  %699 = vmatprep.subr.msk.bf16.mxu0 %vm931_vm1, %v697_v14  ;;  %p786_p12 = pnand %p785_p11, %p909_p5  ;;  %p793_p2 = por %p792_p1, %p791_p0 }
  0x23   : > { %730 = vmatprep.subr.msk.bf16.mxu1 %vm931_vm1, %v697_v14 }
  0x24   : > { %p787_p13 = pneg %p786_p12 }
  0x26   : > { %p794_p3 = pnand %p793_p2, %p787_p13 }
  0x29   : > { %702 = vmatpush3.bf16.xpose.msk.msra.mxu0 %vm931_vm1, %v697_v14 }
  0x2a   : > { %738 = vmatpush3.bf16.xpose.msk.msra.mxu1 %vm931_vm1, %v697_v14  ;;  %705 = vmatprep.subr.msk.bf16.mxu0 %vm931_vm1, %v703_v17 }
  0x2b   : > { %731 = vmatprep.subr.msk.bf16.mxu1 %vm931_vm1, %v703_v17 }
  0x31   : > { %708 = vmatpush3.bf16.xpose.msk.msra.mxu0 %vm931_vm1, %v703_v17 }
  0x32   : > { %739 = vmatpush3.bf16.xpose.msk.msra.mxu1 %vm931_vm1, %v703_v17  ;;  %711 = vmatprep.subr.msk.bf16.mxu0 %vm931_vm1, %v709_v20 }
  0x33   : > { %732 = vmatprep.subr.msk.bf16.mxu1 %vm931_vm1, %v709_v20 }
  0x39   : > { %714 = vmatpush3.bf16.xpose.msk.msra.mxu0 %vm931_vm1, %v709_v20 }
  0x3a   : > { %740 = vmatpush3.bf16.xpose.msk.msra.mxu1 %vm931_vm1, %v709_v20  ;;  %717 = vmatprep.subr.msk.bf16.mxu0 %vm931_vm1, %v715_v23 }
  0x3b   : > { %733 = vmatprep.subr.msk.bf16.mxu1 %vm931_vm1, %v715_v23 }
  0x41   : > { %720 = vmatpush3.bf16.xpose.msk.msra.mxu0 %vm931_vm1, %v715_v23 }
  0x42   : > { %741 = vmatpush3.bf16.xpose.msk.msra.mxu1 %vm931_vm1, %v715_v23  ;;  %723 = vmatprep.subr.msk.bf16.mxu0 %vm931_vm1, %v721_v26 }
  0x43   : > { %734 = vmatprep.subr.msk.bf16.mxu1 %vm931_vm1, %v721_v26 }
  0x49   : > { %726 = vmatpush3.bf16.xpose.msk.msra.mxu0 %vm931_vm1, %v721_v26 }
  0x4a   : > { %742 = vmatpush3.bf16.xpose.msk.msra.mxu1 %vm931_vm1, %v721_v26 }
  0x50   : > { %656 = vmatmul.mubr.msk.f32.vlgmr.msra.gmra.mrb[0].mxu0 %vm211_vm0, %v173_v27 }
  0x51   : > { %668 = vmatmul.mubr.msk.f32.vlgmr.msra.gmra.mrb[0].mxu1 %vm211_vm0, %v181_v28  ;;  %658 = vmatprep.mubr.msk.f32.mxu0 %vm211_vm0, %v174_v29 }
  0x52   : > { %670 = vmatprep.mubr.msk.f32.mxu1 %vm211_vm0, %v182_v30 }
  0x54   : > { %659 = vmatmul.mubr.msk.f32.gmra.mrb[2].mxu0 %vm211_vm0, %v175_v31 }
  0x55   : > { %671 = vmatmul.mubr.msk.f32.gmra.mrb[2].mxu1 %vm211_vm0, %v183_v32  ;;  %661 = vmatprep.mubr.msk.f32.mxu0 %vm211_vm0, %v176_v33 }
  0x56   : > { %673 = vmatprep.mubr.msk.f32.mxu1 %vm211_vm0, %v184_v34 }
  0x58   : > { %662 = vmatmul.mubr.msk.f32.gmra.mrb[4].mxu0 %vm211_vm0, %v177_v35 }
  0x59   : > { %674 = vmatmul.mubr.msk.f32.gmra.mrb[4].mxu1 %vm211_vm0, %v185_v36  ;;  %664 = vmatprep.mubr.msk.f32.mxu0 %vm211_vm0, %v178_v37 }
  0x5a   : > { %676 = vmatprep.mubr.msk.f32.mxu1 %vm211_vm0, %v186_v38 }
  0x5c   : > { %665 = vmatmul.mubr.msk.f32.gmra.mrb[6].mxu0 %vm211_vm0, %v179_v39 }
  0x5d   : > { %677 = vmatmul.mubr.msk.f32.gmra.mrb[6].mxu1 %vm211_vm0, %v187_v40 }
 0x123   : > { %v657_v42 = vpop.f32.mrb[0].mxu0 }
 0x124   : > { %v669_v43 = vpop.f32.mrb[0].mxu1  ;;  %v380_v44 = vadd.f32 %v657_v42, %v552_v41  ;;  %v374_v46 = vpop.f32.mrb[1].mxu0 }
 0x125   : > { %v420_v45 = vadd.f32 %v669_v43, %v552_v41  ;;  %v414_v47 = vpop.f32.mrb[1].mxu1  ;;  %v375_v48 = vadd.f32 %v552_v41, %v374_v46 }
 0x126   : > { %v415_v49 = vadd.f32 %v552_v41, %v414_v47  ;;  %454 = vst [vmem:[%s1081_s19 + $0x8] sm:$0xff] %v380_v44 }
 0x127   : > { %462 = vst [vmem:[%s1081_s19 + $0x48] sm:$0xff] %v420_v45  ;;  %453 = vst [vmem:[%s1081_s19] sm:$0xff] %v375_v48  ;;  %v660_v50 = vpop.f32.mrb[2].mxu0 }
 0x128   : > { %461 = vst [vmem:[%s1081_s19 + $0x40] sm:$0xff] %v415_v49  ;;  %v672_v51 = vpop.f32.mrb[2].mxu1  ;;  %v390_v52 = vadd.f32 %v660_v50, %v552_v41  ;;  %v384_v54 = vpop.f32.mrb[3].mxu0 }
 0x129   : > { %v430_v53 = vadd.f32 %v672_v51, %v552_v41  ;;  %v424_v55 = vpop.f32.mrb[3].mxu1  ;;  %v385_v56 = vadd.f32 %v552_v41, %v384_v54 }
 0x12a   : > { %v425_v57 = vadd.f32 %v552_v41, %v424_v55  ;;  %456 = vst [vmem:[%s1081_s19 + $0x18] sm:$0xff] %v390_v52 }
 0x12b   : > { %464 = vst [vmem:[%s1081_s19 + $0x58] sm:$0xff] %v430_v53  ;;  %455 = vst [vmem:[%s1081_s19 + $0x10] sm:$0xff] %v385_v56  ;;  %v663_v58 = vpop.f32.mrb[4].mxu0 }
 0x12c   : > { %463 = vst [vmem:[%s1081_s19 + $0x50] sm:$0xff] %v425_v57  ;;  %v675_v59 = vpop.f32.mrb[4].mxu1  ;;  %v400_v60 = vadd.f32 %v663_v58, %v552_v41  ;;  %v394_v62 = vpop.f32.mrb[5].mxu0 }
 0x12d   : > { %v440_v61 = vadd.f32 %v675_v59, %v552_v41  ;;  %v434_v63 = vpop.f32.mrb[5].mxu1  ;;  %v395_v0 = vadd.f32 %v552_v41, %v394_v62 }
 0x12e   : > { %v435_v1 = vadd.f32 %v552_v41, %v434_v63  ;;  %458 = vst [vmem:[%s1081_s19 + $0x28] sm:$0xff] %v400_v60 }
 0x12f   : > { %466 = vst [vmem:[%s1081_s19 + $0x68] sm:$0xff] %v440_v61  ;;  %457 = vst [vmem:[%s1081_s19 + $0x20] sm:$0xff] %v395_v0  ;;  %v666_v2 = vpop.f32.mrb[6].mxu0 }
 0x130   : > { %465 = vst [vmem:[%s1081_s19 + $0x60] sm:$0xff] %v435_v1  ;;  %v678_v3 = vpop.f32.mrb[6].mxu1  ;;  %v410_v4 = vadd.f32 %v666_v2, %v552_v41  ;;  %v404_v6 = vpop.f32.mrb[7].mxu0 }
 0x131   : > { %v450_v5 = vadd.f32 %v678_v3, %v552_v41  ;;  %v444_v7 = vpop.f32.mrb[7].mxu1  ;;  %v405_v8 = vadd.f32 %v552_v41, %v404_v6 }
 0x132   : > { %v445_v9 = vadd.f32 %v552_v41, %v444_v7  ;;  %460 = vst [vmem:[%s1081_s19 + $0x38] sm:$0xff] %v410_v4 }
 0x133   : > { %468 = vst [vmem:[%s1081_s19 + $0x78] sm:$0xff] %v450_v5  ;;  %459 = vst [vmem:[%s1081_s19 + $0x30] sm:$0xff] %v405_v8 }
 0x134   : > { %467 = vst [vmem:[%s1081_s19 + $0x70] sm:$0xff] %v445_v9 }
 0x135   : > { %797 = shalt.err (!%p794_p3)
}
 0x136   : > { %s798_s17 = scalar_lea.hbm %s1100_s16, 2048  ;;  %s802_s25 = scalar_lea.hbm %s1154_s3, 8192 }
 0x137   : > { %p799_p4 = scmp.ne.s32.totalorder %s1100_s16, %s798_s17  ;;  %p803_p9 = scmp.lt.u32.totalorder %s1100_s16, %s1154_s3 }
 0x138   : > { %p804_p10 = scmp.lt.u32.totalorder %s802_s25, %s798_s17  ;;  %p806_p12 = scmp.lt.u32.totalorder %s798_s17, %s1100_s16 }
 0x139   : > { %p800_p7 = pnand %p799_p4, %p909_p5 }
 0x13a   : > { %p805_p11 = por %p804_p10, %p803_p9 }
 0x13b   : > { %p801_p8 = pneg %p800_p7 }
 0x13c   : > { %p807_p13 = por %p806_p12, %p805_p11 }
 0x13e   : > { %p808_p0 = pnand %p807_p13, %p801_p8 }
 0x140   : > { %811 = shalt.err (!%p808_p0)
}
 0x141   : > { %s849_s28 = smov 128   ;;  %s850_s29 = smov 8  }
 0x142   : > { %743 = dma.vmem_to_hbm [thread:$0]  (%p909_p5), %s1102_s4, 2048, %s1100_s16, %s1110_s7, %s849_s28, %s849_s28, %s850_s29  }
 0x143 PF: > { %p749_p1 = scmp.ge.s32.totalorder %s846_s15, 2  ;;  %s498_s19 = sand.u32 1, %s834_s12  }
 0x144   : > { %s499_s30 = scalar_lea.sflag [#allocation3], %s498_s19 }
 0x145   : > { %p746_p2 = pnand %p749_p1, %p913_p6 }
 0x147   : > { %829 = dma.done.wait (!%p746_p2), %s499_s30, 2048  }
 0x148   : > { %831 = vsyncadd (!%p746_p2), %s499_s30, 4294965248  ;;  %p13_p3 = scmp.ge.s32.totalorder %s896_s18, 6   ;;  %s1159_s12 = smov %s838_s13 }
 0x149   : > { %s1160_s13 = smov %s842_s14  ;;  %s1161_s14 = smov %s907_s21 }
 0x14a   : > { %s1162_s15 = smov %s896_s18  ;;  %15 = sbr.rel (!%p13_p3) target bundleno = 3 (0x3), region = 67 }
 0x151   :  { %504 = vsyncpa [#allocation3], 1 }
 0x152   :  { %506 = vsyncpa [#allocation3 + $0x1], 1 }

</bundles_post_ra>
